<compile_context>
chip_gen: v5e
topology: v5e:2x2
jax: 0.10.0
libtpu: 0.0.40
codegen_flags: <defaults>
</compile_context>

<pallas_src>
import jax
import jax.numpy as jnp
from jax import lax
from jax.experimental import pallas as pl
from jax.experimental.pallas import tpu as pltpu

BN_EPS = 1e-5


# ------------------------------------------------------------------
# Host-side helpers
# ------------------------------------------------------------------
def _fold_bn(bn):
    gamma, beta, mean, var = bn
    scale = gamma / jnp.sqrt(var + BN_EPS)
    shift = beta - mean * scale
    return scale, shift


def _block_diag(m, reps):
    """reps copies of (kin, kout) matrix m on the diagonal -> (reps*kin, reps*kout)."""
    kin, kout = m.shape
    bd = jnp.zeros((reps * kin, reps * kout), m.dtype)
    for r in range(reps):
        bd = bd.at[r * kin:(r + 1) * kin, r * kout:(r + 1) * kout].set(m)
    return bd


def _pick_b_tile(n, h, w, chans):
    """Images per grid step: aim for a few hundred MXU rows while keeping the per-step
    whole-image activations comfortably inside VMEM (conservative across v5e/v6e/v7x)."""
    rows_target = max(1, 256 // max(h, 1))
    per_image = h * w * chans * 4 * 8          # ~8 live f32 copies of the widest tensor
    vmem_cap = max(1, (8 * 1024 * 1024) // max(per_image, 1))
    bt = max(1, min(n, rows_target, vmem_cap))
    while n % bt:
        bt -= 1
    return bt


# ------------------------------------------------------------------
# Optimized fused kernel: stride == 1, lane-packed layout
# ------------------------------------------------------------------
def _make_block_kernel_packed(h, w, planes, cout, shortcut, b_tile):
    wp = w * planes        # packed depthwise lane width
    wc = w * cout          # packed output lane width

    def kernel(x_ref, w1_ref, s1_ref, w2_ref, s2_ref, w3_ref, s3_ref, o_ref):
        xw = x_ref.shape[2]                                    # w * cin
        x2d = x_ref[...].reshape(b_tile * h, xw)               # (rows, w*cin) f32
        x_bf = x2d.astype(jnp.bfloat16)

        # ---- (1) expand 1x1 (+ fused conv-shortcut along N) : bf16 MXU, f32 acc ----
        h1_full = jnp.dot(x_bf, w1_ref[...], preferred_element_type=jnp.float32)
        h1_full = h1_full + s1_ref[...]                        # folded bias + BN shift
        if shortcut == "conv":
            h1 = jnp.clip(h1_full[:, :wp], 0.0, 6.0)           # expand half (relu6)
        else:
            h1 = jnp.clip(h1_full, 0.0, 6.0)

        # ---- (2) depthwise 3x3, stride 1, pad 1, lane-packed (w*planes lanes) ----
        # kw taps  -> lane rolls by `planes` (border wrap killed by zeroed weights)
        # kh taps  -> sublane rolls + two hoisted row masks (no padded halo copy)
        xin = h1.reshape(b_tile, h, wp)
        w2 = w2_ref[...]                                       # (9, w*planes)
        row_ids = lax.broadcasted_iota(jnp.int32, (1, h, 1), 1)
        acc = None
        for kh in range(3):
            dh = kh - 1
            if dh == 0:
                rows = xin
            else:
                rows = pltpu.roll(xin, shift=(-dh) % h, axis=1)
                if dh == -1:
                    rows = jnp.where(row_ids >= 1, rows, 0.0)
                else:
                    rows = jnp.where(row_ids <= h - 2, rows, 0.0)
            for kw in range(3):
                dw = kw - 1
                if dw == 0:
                    shifted = rows
                else:
                    shifted = pltpu.roll(rows, shift=(-dw * planes) % wp, axis=2)
                term = shifted * w2[kh * 3 + kw]
                acc = term if acc is None else acc + term
        h2 = jnp.clip(acc + s2_ref[...], 0.0, 6.0)             # (b_tile, h, w*planes)

        # ---- (3) project 1x1 : block-diagonal MXU matmul -> lane-dense output ----
        h2d = h2.reshape(b_tile * h, wp).astype(jnp.bfloat16)
        y = jnp.dot(h2d, w3_ref[...], preferred_element_type=jnp.float32)
        y = y + s3_ref[...]
        if shortcut == "conv":
            y = y + h1_full[:, wp:]                            # shortcut half (no relu6)
        else:                                                  # identity: cin == cout
            y = y + x2d
        o_ref[...] = y.reshape(b_tile, h, wc).astype(o_ref.dtype)

    return kernel


def _block_forward_packed(x_nchw, p):
    n, cin, h, w = x_nchw.shape
    planes = p["w1"].shape[1]
    cout = p["w3"].shape[1]
    wp, wc = w * planes, w * cout

    # NCHW -> NHWC, then pack (w, cin) onto the lane axis: (n, h, w*cin)
    x = jnp.transpose(x_nchw, (0, 2, 3, 1)).reshape(n, h, w * cin)

    sc1, sh1 = _fold_bn(p["bn1"])
    sc2, sh2 = _fold_bn(p["bn2"])
    sc3, sh3 = _fold_bn(p["bn3"])

    w1 = p["w1"] * sc1[None, :]
    s1 = p["b1"] * sc1 + sh1
    w2 = (p["w2"] * sc2[None, None, :]).reshape(9, planes)     # taps (kh, kw) row-major
    s2 = p["b2"] * sc2 + sh2
    w3 = p["w3"] * sc3[None, :]
    s3 = p["b3"] * sc3 + sh3

    # Block-diagonal (per output column) 1x1 weights: matmuls read/write the packed
    # (rows, w*chan) layout directly, so no minor-dim relayout happens in the kernel.
    w1_bd = _block_diag(w1, w)                                 # (w*cin, w*planes)
    w3_bd = _block_diag(w3, w).astype(jnp.bfloat16)            # (w*planes, w*cout)
    s1_p = jnp.tile(s1, w).reshape(1, wp)
    s2_p = jnp.tile(s2, w).reshape(1, wp)
    s3_p = jnp.tile(s3, w).reshape(1, wc)

    # Depthwise taps tiled over w; the wrap-around kw taps at the image borders are
    # zeroed here so the kernel needs no per-tap iota/compare/select.
    w2_p = jnp.tile(w2, (1, w))                                # (9, w*planes)
    for kh in range(3):
        w2_p = w2_p.at[kh * 3 + 0, :planes].set(0.0)           # kw=0 invalid at ow=0
        w2_p = w2_p.at[kh * 3 + 2, (w - 1) * planes:].set(0.0)  # kw=2 invalid at ow=w-1

    if cin != cout:
        shortcut = "conv"
        scs, shs = _fold_bn(p["bns"])
        ws_bd = _block_diag(p["ws"] * scs[None, :], w)         # (w*cin, w*cout)
        ss_p = jnp.tile(p["bs"] * scs + shs, w).reshape(1, wc)
        w1cat = jnp.concatenate([w1_bd, ws_bd], axis=1).astype(jnp.bfloat16)
        s1cat = jnp.concatenate([s1_p, ss_p], axis=1)
    else:
        shortcut = "identity"
        w1cat = w1_bd.astype(jnp.bfloat16)
        s1cat = s1_p

    b_tile = _pick_b_tile(n, h, w, max(planes, cout))
    n_cols = w1cat.shape[1]

    kernel = _make_block_kernel_packed(h, w, planes, cout, shortcut, b_tile)
    out = pl.pallas_call(
        kernel,
        out_shape=jax.ShapeDtypeStruct((n, h, wc), jnp.float32),
        grid=(n // b_tile,),
        in_specs=[
            pl.BlockSpec((b_tile, h, w * cin), lambda b: (b, 0, 0)),
            pl.BlockSpec((w * cin, n_cols), lambda b: (0, 0)),
            pl.BlockSpec((1, n_cols), lambda b: (0, 0)),
            pl.BlockSpec((9, wp), lambda b: (0, 0)),
            pl.BlockSpec((1, wp), lambda b: (0, 0)),
            pl.BlockSpec((wp, wc), lambda b: (0, 0)),
            pl.BlockSpec((1, wc), lambda b: (0, 0)),
        ],
        out_specs=pl.BlockSpec((b_tile, h, wc), lambda b: (b, 0, 0)),
        compiler_params=pltpu.CompilerParams(
            dimension_semantics=("parallel",),                 # megacore sharding on v7x
            vmem_limit_bytes=32 * 1024 * 1024,
        ),
    )(x, w1cat, s1cat, w2_p, s2_p, w3_bd, s3_p)

    out = out.reshape(n, h, w, cout)
    return jnp.transpose(out, (0, 3, 1, 2))                    # back to NCHW


# ------------------------------------------------------------------
# Generic fused kernel: stride != 1 (no shortcut in the module then)
# ------------------------------------------------------------------
def _make_block_kernel_generic(h, w, h_out, w_out, stride, planes, cout):
    def kernel(x_ref, w1_ref, s1_ref, w2_ref, s2_ref, w3_ref, s3_ref, o_ref):
        x2d = x_ref[0]                                         # (H*W, Cin) f32
        x_bf = x2d.astype(jnp.bfloat16)

        h1 = jnp.dot(x_bf, w1_ref[...], preferred_element_type=jnp.float32)
        h1 = jnp.clip(h1 + s1_ref[...], 0.0, 6.0)              # (H*W, planes)

        xin = h1.reshape(h, w, planes)
        zrow = jnp.zeros((1, w, planes), jnp.float32)
        xp = jnp.concatenate([zrow, xin, zrow], axis=0)        # H halo only
        w2 = w2_ref[...]                                       # (9, planes)

        # hoisted border masks (computed once, not per tap)
        ow_ids = lax.broadcasted_iota(jnp.int32, (1, w_out, 1), 1)
        src_m = ow_ids * stride - 1
        mask_m = (src_m >= 0) & (src_m < w)
        src_p = ow_ids * stride + 1
        mask_p = (src_p >= 0) & (src_p < w)

        acc = None
        for kh in range(3):
            rows = xp[kh:kh + (h_out - 1) * stride + 1:stride, :, :]
            for kw in range(3):
                dw = kw - 1
                if dw == 0:
                    shifted = rows
                else:
                    shifted = pltpu.roll(rows, shift=(-dw) % w, axis=1)
                cols = shifted[:, 0:(w_out - 1) * stride + 1:stride, :]
                if dw == -1:
                    cols = jnp.where(mask_m, cols, 0.0)
                elif dw == 1:
                    cols = jnp.where(mask_p, cols, 0.0)
                term = cols * w2[kh * 3 + kw]
                acc = term if acc is None else acc + term
        h2 = jnp.clip(acc + s2_ref[...], 0.0, 6.0)

        h2d = h2.reshape(h_out * w_out, planes).astype(jnp.bfloat16)
        y = jnp.dot(h2d, w3_ref[...], preferred_element_type=jnp.float32)
        y = y + s3_ref[...]
        o_ref[0] = y.astype(o_ref.dtype)

    return kernel


def _block_forward_generic(x_nchw, p, *, stride):
    n, cin, h, w = x_nchw.shape
    planes = p["w1"].shape[1]
    cout = p["w3"].shape[1]
    h_out = (h + 2 - 3) // stride + 1
    w_out = (w + 2 - 3) // stride + 1

    x = jnp.transpose(x_nchw, (0, 2, 3, 1)).reshape(n, h * w, cin)

    sc1, sh1 = _fold_bn(p["bn1"])
    sc2, sh2 = _fold_bn(p["bn2"])
    sc3, sh3 = _fold_bn(p["bn3"])
    w1 = (p["w1"] * sc1[None, :]).astype(jnp.bfloat16)
    s1 = (p["b1"] * sc1 + sh1).reshape(1, planes)
    w2 = (p["w2"] * sc2[None, None, :]).reshape(9, planes)
    s2 = (p["b2"] * sc2 + sh2).reshape(1, planes)
    w3 = (p["w3"] * sc3[None, :]).astype(jnp.bfloat16)
    s3 = (p["b3"] * sc3 + sh3).reshape(1, cout)

    kernel = _make_block_kernel_generic(h, w, h_out, w_out, stride, planes, cout)
    out = pl.pallas_call(
        kernel,
        out_shape=jax.ShapeDtypeStruct((n, h_out * w_out, cout), jnp.float32),
        grid=(n,),
        in_specs=[
            pl.BlockSpec((1, h * w, cin), lambda b: (b, 0, 0)),
            pl.BlockSpec((cin, planes), lambda b: (0, 0)),
            pl.BlockSpec((1, planes), lambda b: (0, 0)),
            pl.BlockSpec((9, planes), lambda b: (0, 0)),
            pl.BlockSpec((1, planes), lambda b: (0, 0)),
            pl.BlockSpec((planes, cout), lambda b: (0, 0)),
            pl.BlockSpec((1, cout), lambda b: (0, 0)),
        ],
        out_specs=pl.BlockSpec((1, h_out * w_out, cout), lambda b: (b, 0, 0)),
        compiler_params=pltpu.CompilerParams(
            dimension_semantics=("parallel",),
            vmem_limit_bytes=32 * 1024 * 1024,
        ),
    )(x, w1, s1, w2, s2, w3, s3)

    out = out.reshape(n, h_out, w_out, cout)
    return jnp.transpose(out, (0, 3, 1, 2))


def block_forward(x_nchw, p, *, stride):
    if stride == 1:
        return _block_forward_packed(x_nchw, p)
    return _block_forward_generic(x_nchw, p, stride=stride)


# ------------------------------------------------------------------
# Pure-JAX reference (lax.conv) for verification
# ------------------------------------------------------------------
def _bn_ref(y_nchw, bn):
    gamma, beta, mean, var = bn
    inv = gamma / jnp.sqrt(var + BN_EPS)
    return y_nchw * inv[None, :, None, None] + (beta - mean * inv)[None, :, None, None]


def block_reference(x, p, *, stride):
    dn = ("NCHW", "OIHW", "NCHW")
    relu6 = lambda v: jnp.clip(v, 0.0, 6.0)

    w1 = jnp.transpose(p["w1"])[:, :, None, None]
    y = lax.conv_general_dilated(x, w1, (1, 1), "VALID", dimension_numbers=dn)
    y = y + p["b1"][None, :, None, None]
    y = relu6(_bn_ref(y, p["bn1"]))

    planes = p["w2"].shape[-1]
    w2 = jnp.transpose(p["w2"], (2, 0, 1))[:, None]            # (planes, 1, 3, 3)
    y = lax.conv_general_dilated(y, w2, (stride, stride), ((1, 1), (1, 1)),
                                 dimension_numbers=dn, feature_group_count=planes)
    y = y + p["b2"][None, :, None, None]
    y = relu6(_bn_ref(y, p["bn2"]))

    w3 = jnp.transpose(p["w3"])[:, :, None, None]
    y = lax.conv_general_dilated(y, w3, (1, 1), "VALID", dimension_numbers=dn)
    y = y + p["b3"][None, :, None, None]
    y = _bn_ref(y, p["bn3"])

    if stride == 1:
        cin, cout = x.shape[1], y.shape[1]
        if cin != cout:
            ws = jnp.transpose(p["ws"])[:, :, None, None]
            s = lax.conv_general_dilated(x, ws, (1, 1), "VALID", dimension_numbers=dn)
            s = s + p["bs"][None, :, None, None]
            s = _bn_ref(s, p["bns"])
        else:
            s = x
        y = y + s
    return y


# ------------------------------------------------------------------
# Deterministic parameter init
# ------------------------------------------------------------------
def init_params(key, in_planes, out_planes, expansion):
    planes = expansion * in_planes
    ks = jax.random.split(key, 12)

    def nrm(k, shape, s=0.1):
        return s * jax.random.normal(k, shape, jnp.float32)

    def bn_init(k, c):
        k1, k2, k3, k4 = jax.random.split(k, 4)
        gamma = 1.0 + 0.1 * jax.random.normal(k1, (c,), jnp.float32)
        beta = 0.1 * jax.random.normal(k2, (c,), jnp.float32)
        mean = 0.1 * jax.random.normal(k3, (c,), jnp.float32)
        var = jnp.abs(jax.random.normal(k4, (c,), jnp.float32)) + 0.5
        return (gamma, beta, mean, var)

    return {
        "w1": nrm(ks[0], (in_planes, planes)), "b1": nrm(ks[1], (planes,)),
        "bn1": bn_init(ks[2], planes),
        "w2": nrm(ks[3], (3, 3, planes)), "b2": nrm(ks[4], (planes,)),
        "bn2": bn_init(ks[5], planes),
        "w3": nrm(ks[6], (planes, out_planes)), "b3": nrm(ks[7], (out_planes,)),
        "bn3": bn_init(ks[8], out_planes),
        "ws": nrm(ks[9], (in_planes, out_planes)), "bs": nrm(ks[10], (out_planes,)),
        "bns": bn_init(ks[11], out_planes),
    }


# ------------------------------------------------------------------
if __name__ == "__main__":
    # Block(in_planes=8, out_planes=16, expansion=2, stride=1) on a (2, 8, 8, 8) NCHW input.
    N, CIN, H, W = 2, 8, 8, 8
    EXPANSION, COUT, STRIDE = 2, 16, 1

    key = jax.random.PRNGKey(0)
    kx, kp = jax.random.split(key)
    x = jax.random.normal(kx, (N, CIN, H, W), jnp.float32)
    params = init_params(kp, CIN, COUT, EXPANSION)

    out = jax.block_until_ready(block_forward(x, params, stride=STRIDE))

    ref = block_reference(x, params, stride=STRIDE)
    assert out.shape == ref.shape, (out.shape, ref.shape)
    # bf16 MXU operands (f32 accumulation) -> relaxed tolerance vs. the f32 reference.
    err = float(jnp.max(jnp.abs(out - ref)))
    assert jnp.allclose(out, ref, atol=2e-2, rtol=2e-2), err

    print("KERNEL_OK")
</pallas_src>

<mosaic_0001>
module attributes {stable_mosaic.version = 11 : i64} {
  func.func @kernel(%arg0: i32, %arg1: memref<2x8x64xf32, #tpu.memory_space<vmem>>, %arg2: memref<64x256xbf16, #tpu.memory_space<vmem>>, %arg3: memref<1x256xf32, #tpu.memory_space<vmem>>, %arg4: memref<9x128xf32, #tpu.memory_space<vmem>>, %arg5: memref<1x128xf32, #tpu.memory_space<vmem>>, %arg6: memref<128x128xbf16, #tpu.memory_space<vmem>>, %arg7: memref<1x128xf32, #tpu.memory_space<vmem>>, %arg8: memref<2x8x128xf32, #tpu.memory_space<vmem>>) attributes {dimension_semantics = [#tpu.dimension_semantics<parallel>], iteration_bounds = array<i64: 1>, scalar_prefetch = 0 : i64, scratch_operands = 0 : i64, tpu.core_type = #tpu.core_type<tc>, window_params = [{transform_indices = @transform_0, window_bounds = array<i64: 2, 8, 64>}, {pipeline_mode = #tpu.pipeline_mode<synchronous>, transform_indices = @transform_1, window_bounds = array<i64: 64, 256>}, {pipeline_mode = #tpu.pipeline_mode<synchronous>, transform_indices = @transform_2, window_bounds = array<i64: 1, 256>}, {pipeline_mode = #tpu.pipeline_mode<synchronous>, transform_indices = @transform_3, window_bounds = array<i64: 9, 128>}, {pipeline_mode = #tpu.pipeline_mode<synchronous>, transform_indices = @transform_4, window_bounds = array<i64: 1, 128>}, {pipeline_mode = #tpu.pipeline_mode<synchronous>, transform_indices = @transform_5, window_bounds = array<i64: 128, 128>}, {pipeline_mode = #tpu.pipeline_mode<synchronous>, transform_indices = @transform_6, window_bounds = array<i64: 1, 128>}, {transform_indices = @transform_7, window_bounds = array<i64: 2, 8, 128>}]} {
    %c0 = arith.constant 0 : index
    %c0_0 = arith.constant 0 : index
    %c0_1 = arith.constant 0 : index
    %0 = vector.load %arg1[%c0, %c0_0, %c0_1] : memref<2x8x64xf32, #tpu.memory_space<vmem>>, vector<2x8x64xf32>
    %1 = vector.shape_cast %0 : vector<2x8x64xf32> to vector<16x64xf32>
    %2 = arith.truncf %1 : vector<16x64xf32> to vector<16x64xbf16>
    %c0_2 = arith.constant 0 : index
    %c0_3 = arith.constant 0 : index
    %3 = vector.load %arg2[%c0_2, %c0_3] : memref<64x256xbf16, #tpu.memory_space<vmem>>, vector<64x256xbf16>
    %cst = arith.constant dense<0.000000e+00> : vector<16x256xf32>
    %4 = tpu.matmul %2, %3, %cst {dimension_numbers = #tpu.dot_dimension_numbers<[1], [0], [0], [1], [0, 0, 1, 1], [], []>} : vector<16x64xbf16>, vector<64x256xbf16>, vector<16x256xf32> -> vector<16x256xf32>
    %c0_4 = arith.constant 0 : index
    %c0_5 = arith.constant 0 : index
    %5 = vector.load %arg3[%c0_4, %c0_5] : memref<1x256xf32, #tpu.memory_space<vmem>>, vector<1x256xf32>
    %6 = vector.broadcast %5 : vector<1x256xf32> to vector<16x256xf32>
    %7 = arith.addf %4, %6 : vector<16x256xf32>
    %8 = vector.extract_strided_slice %7 {offsets = [0, 0], sizes = [16, 128], strides = [1, 1]} : vector<16x256xf32> to vector<16x128xf32>
    %cst_6 = arith.constant 0.000000e+00 : f32
    %cst_7 = arith.constant 6.000000e+00 : f32
    %9 = vector.broadcast %cst_6 : f32 to vector<16x128xf32>
    %10 = arith.maximumf %9, %8 : vector<16x128xf32>
    %11 = vector.broadcast %cst_7 : f32 to vector<16x128xf32>
    %12 = arith.minimumf %11, %10 : vector<16x128xf32>
    %13 = vector.shape_cast %12 : vector<16x128xf32> to vector<2x8x128xf32>
    %c0_8 = arith.constant 0 : index
    %c0_9 = arith.constant 0 : index
    %14 = vector.load %arg4[%c0_8, %c0_9] : memref<9x128xf32, #tpu.memory_space<vmem>>, vector<9x128xf32>
    %15 = tpu.iota {dimensions = array<i32: 1>} : vector<1x8x1xi32>
    %c1_i32 = arith.constant 1 : i32
    %16 = tpu.dynamic_rotate %13 by %c1_i32 dim 1 : vector<2x8x128xf32>, i32 -> vector<2x8x128xf32>
    %c1_i32_10 = arith.constant 1 : i32
    %17 = vector.broadcast %c1_i32_10 : i32 to vector<1x8x1xi32>
    %18 = arith.cmpi sge, %15, %17 : vector<1x8x1xi32>
    %cst_11 = arith.constant 0.000000e+00 : f32
    %19 = vector.shape_cast %18 : vector<1x8x1xi1> to vector<1x8x1xi1>
    %20 = vector.broadcast %19 : vector<1x8x1xi1> to vector<2x8x128xi1>
    %21 = vector.broadcast %cst_11 : f32 to vector<2x8x128xf32>
    %22 = arith.select %20, %16, %21 : vector<2x8x128xi1>, vector<2x8x128xf32>
    %c16_i32 = arith.constant 16 : i32
    %23 = tpu.dynamic_rotate %22 by %c16_i32 dim 2 : vector<2x8x128xf32>, i32 -> vector<2x8x128xf32>
    %24 = vector.extract_strided_slice %14 {offsets = [0, 0], sizes = [1, 128], strides = [1, 1]} : vector<9x128xf32> to vector<1x128xf32>
    %25 = vector.shape_cast %24 : vector<1x128xf32> to vector<128xf32>
    %26 = vector.shape_cast %25 : vector<128xf32> to vector<1x1x128xf32>
    %27 = vector.broadcast %26 : vector<1x1x128xf32> to vector<2x8x128xf32>
    %28 = arith.mulf %23, %27 : vector<2x8x128xf32>
    %29 = vector.extract_strided_slice %14 {offsets = [1, 0], sizes = [1, 128], strides = [1, 1]} : vector<9x128xf32> to vector<1x128xf32>
    %30 = vector.shape_cast %29 : vector<1x128xf32> to vector<128xf32>
    %31 = vector.shape_cast %30 : vector<128xf32> to vector<1x1x128xf32>
    %32 = vector.broadcast %31 : vector<1x1x128xf32> to vector<2x8x128xf32>
    %33 = arith.mulf %22, %32 : vector<2x8x128xf32>
    %34 = arith.addf %28, %33 : vector<2x8x128xf32>
    %c112_i32 = arith.constant 112 : i32
    %35 = tpu.dynamic_rotate %22 by %c112_i32 dim 2 : vector<2x8x128xf32>, i32 -> vector<2x8x128xf32>
    %36 = vector.extract_strided_slice %14 {offsets = [2, 0], sizes = [1, 128], strides = [1, 1]} : vector<9x128xf32> to vector<1x128xf32>
    %37 = vector.shape_cast %36 : vector<1x128xf32> to vector<128xf32>
    %38 = vector.shape_cast %37 : vector<128xf32> to vector<1x1x128xf32>
    %39 = vector.broadcast %38 : vector<1x1x128xf32> to vector<2x8x128xf32>
    %40 = arith.mulf %35, %39 : vector<2x8x128xf32>
    %41 = arith.addf %34, %40 : vector<2x8x128xf32>
    %c16_i32_12 = arith.constant 16 : i32
    %42 = tpu.dynamic_rotate %13 by %c16_i32_12 dim 2 : vector<2x8x128xf32>, i32 -> vector<2x8x128xf32>
    %43 = vector.extract_strided_slice %14 {offsets = [3, 0], sizes = [1, 128], strides = [1, 1]} : vector<9x128xf32> to vector<1x128xf32>
    %44 = vector.shape_cast %43 : vector<1x128xf32> to vector<128xf32>
    %45 = vector.shape_cast %44 : vector<128xf32> to vector<1x1x128xf32>
    %46 = vector.broadcast %45 : vector<1x1x128xf32> to vector<2x8x128xf32>
    %47 = arith.mulf %42, %46 : vector<2x8x128xf32>
    %48 = arith.addf %41, %47 : vector<2x8x128xf32>
    %49 = vector.extract_strided_slice %14 {offsets = [4, 0], sizes = [1, 128], strides = [1, 1]} : vector<9x128xf32> to vector<1x128xf32>
    %50 = vector.shape_cast %49 : vector<1x128xf32> to vector<128xf32>
    %51 = vector.shape_cast %50 : vector<128xf32> to vector<1x1x128xf32>
    %52 = vector.broadcast %51 : vector<1x1x128xf32> to vector<2x8x128xf32>
    %53 = arith.mulf %13, %52 : vector<2x8x128xf32>
    %54 = arith.addf %48, %53 : vector<2x8x128xf32>
    %c112_i32_13 = arith.constant 112 : i32
    %55 = tpu.dynamic_rotate %13 by %c112_i32_13 dim 2 : vector<2x8x128xf32>, i32 -> vector<2x8x128xf32>
    %56 = vector.extract_strided_slice %14 {offsets = [5, 0], sizes = [1, 128], strides = [1, 1]} : vector<9x128xf32> to vector<1x128xf32>
    %57 = vector.shape_cast %56 : vector<1x128xf32> to vector<128xf32>
    %58 = vector.shape_cast %57 : vector<128xf32> to vector<1x1x128xf32>
    %59 = vector.broadcast %58 : vector<1x1x128xf32> to vector<2x8x128xf32>
    %60 = arith.mulf %55, %59 : vector<2x8x128xf32>
    %61 = arith.addf %54, %60 : vector<2x8x128xf32>
    %c7_i32 = arith.constant 7 : i32
    %62 = tpu.dynamic_rotate %13 by %c7_i32 dim 1 : vector<2x8x128xf32>, i32 -> vector<2x8x128xf32>
    %c6_i32 = arith.constant 6 : i32
    %63 = vector.broadcast %c6_i32 : i32 to vector<1x8x1xi32>
    %64 = arith.cmpi sle, %15, %63 : vector<1x8x1xi32>
    %cst_14 = arith.constant 0.000000e+00 : f32
    %65 = vector.shape_cast %64 : vector<1x8x1xi1> to vector<1x8x1xi1>
    %66 = vector.broadcast %65 : vector<1x8x1xi1> to vector<2x8x128xi1>
    %67 = vector.broadcast %cst_14 : f32 to vector<2x8x128xf32>
    %68 = arith.select %66, %62, %67 : vector<2x8x128xi1>, vector<2x8x128xf32>
    %c16_i32_15 = arith.constant 16 : i32
    %69 = tpu.dynamic_rotate %68 by %c16_i32_15 dim 2 : vector<2x8x128xf32>, i32 -> vector<2x8x128xf32>
    %70 = vector.extract_strided_slice %14 {offsets = [6, 0], sizes = [1, 128], strides = [1, 1]} : vector<9x128xf32> to vector<1x128xf32>
    %71 = vector.shape_cast %70 : vector<1x128xf32> to vector<128xf32>
    %72 = vector.shape_cast %71 : vector<128xf32> to vector<1x1x128xf32>
    %73 = vector.broadcast %72 : vector<1x1x128xf32> to vector<2x8x128xf32>
    %74 = arith.mulf %69, %73 : vector<2x8x128xf32>
    %75 = arith.addf %61, %74 : vector<2x8x128xf32>
    %76 = vector.extract_strided_slice %14 {offsets = [7, 0], sizes = [1, 128], strides = [1, 1]} : vector<9x128xf32> to vector<1x128xf32>
    %77 = vector.shape_cast %76 : vector<1x128xf32> to vector<128xf32>
    %78 = vector.shape_cast %77 : vector<128xf32> to vector<1x1x128xf32>
    %79 = vector.broadcast %78 : vector<1x1x128xf32> to vector<2x8x128xf32>
    %80 = arith.mulf %68, %79 : vector<2x8x128xf32>
    %81 = arith.addf %75, %80 : vector<2x8x128xf32>
    %c112_i32_16 = arith.constant 112 : i32
    %82 = tpu.dynamic_rotate %68 by %c112_i32_16 dim 2 : vector<2x8x128xf32>, i32 -> vector<2x8x128xf32>
    %83 = vector.extract_strided_slice %14 {offsets = [8, 0], sizes = [1, 128], strides = [1, 1]} : vector<9x128xf32> to vector<1x128xf32>
    %84 = vector.shape_cast %83 : vector<1x128xf32> to vector<128xf32>
    %85 = vector.shape_cast %84 : vector<128xf32> to vector<1x1x128xf32>
    %86 = vector.broadcast %85 : vector<1x1x128xf32> to vector<2x8x128xf32>
    %87 = arith.mulf %82, %86 : vector<2x8x128xf32>
    %88 = arith.addf %81, %87 : vector<2x8x128xf32>
    %c0_17 = arith.constant 0 : index
    %c0_18 = arith.constant 0 : index
    %89 = vector.load %arg5[%c0_17, %c0_18] : memref<1x128xf32, #tpu.memory_space<vmem>>, vector<1x128xf32>
    %90 = vector.shape_cast %89 : vector<1x128xf32> to vector<1x1x128xf32>
    %91 = vector.broadcast %90 : vector<1x1x128xf32> to vector<2x8x128xf32>
    %92 = arith.addf %88, %91 : vector<2x8x128xf32>
    %cst_19 = arith.constant 0.000000e+00 : f32
    %cst_20 = arith.constant 6.000000e+00 : f32
    %93 = vector.broadcast %cst_19 : f32 to vector<2x8x128xf32>
    %94 = arith.maximumf %93, %92 : vector<2x8x128xf32>
    %95 = vector.broadcast %cst_20 : f32 to vector<2x8x128xf32>
    %96 = arith.minimumf %95, %94 : vector<2x8x128xf32>
    %97 = vector.shape_cast %96 : vector<2x8x128xf32> to vector<16x128xf32>
    %98 = arith.truncf %97 : vector<16x128xf32> to vector<16x128xbf16>
    %c0_21 = arith.constant 0 : index
    %c0_22 = arith.constant 0 : index
    %99 = vector.load %arg6[%c0_21, %c0_22] : memref<128x128xbf16, #tpu.memory_space<vmem>>, vector<128x128xbf16>
    %cst_23 = arith.constant dense<0.000000e+00> : vector<16x128xf32>
    %100 = tpu.matmul %98, %99, %cst_23 {dimension_numbers = #tpu.dot_dimension_numbers<[1], [0], [0], [1], [0, 0, 1, 1], [], []>} : vector<16x128xbf16>, vector<128x128xbf16>, vector<16x128xf32> -> vector<16x128xf32>
    %c0_24 = arith.constant 0 : index
    %c0_25 = arith.constant 0 : index
    %101 = vector.load %arg7[%c0_24, %c0_25] : memref<1x128xf32, #tpu.memory_space<vmem>>, vector<1x128xf32>
    %102 = vector.broadcast %101 : vector<1x128xf32> to vector<16x128xf32>
    %103 = arith.addf %100, %102 : vector<16x128xf32>
    %104 = vector.extract_strided_slice %7 {offsets = [0, 128], sizes = [16, 128], strides = [1, 1]} : vector<16x256xf32> to vector<16x128xf32>
    %105 = arith.addf %103, %104 : vector<16x128xf32>
    %106 = vector.shape_cast %105 : vector<16x128xf32> to vector<2x8x128xf32>
    %c0_26 = arith.constant 0 : index
    %c0_27 = arith.constant 0 : index
    %c0_28 = arith.constant 0 : index
    %107 = vector.load %arg8[%c0_26, %c0_27, %c0_28] : memref<2x8x128xf32, #tpu.memory_space<vmem>>, vector<2x8x128xf32>
    tpu.vector_store %arg8[%c0_26, %c0_27, %c0_28], %106 {strides = array<i32>} : memref<2x8x128xf32, #tpu.memory_space<vmem>>, vector<2x8x128xf32>,
    return
  }
  func.func @transform_0(%arg0: i32) -> (i32, i32, i32) {
    %c0_i32 = arith.constant 0 : i32
    %c0_i32_0 = arith.constant 0 : i32
    %c0_i32_1 = arith.constant 0 : i32
    return %arg0, %c0_i32, %c0_i32_0 : i32, i32, i32
  }
  func.func @transform_1(%arg0: i32) -> (i32, i32) {
    %c0_i32 = arith.constant 0 : i32
    %c0_i32_0 = arith.constant 0 : i32
    %c0_i32_1 = arith.constant 0 : i32
    return %c0_i32, %c0_i32_0 : i32, i32
  }
  func.func @transform_2(%arg0: i32) -> (i32, i32) {
    %c0_i32 = arith.constant 0 : i32
    %c0_i32_0 = arith.constant 0 : i32
    %c0_i32_1 = arith.constant 0 : i32
    return %c0_i32, %c0_i32_0 : i32, i32
  }
  func.func @transform_3(%arg0: i32) -> (i32, i32) {
    %c0_i32 = arith.constant 0 : i32
    %c0_i32_0 = arith.constant 0 : i32
    %c0_i32_1 = arith.constant 0 : i32
    return %c0_i32, %c0_i32_0 : i32, i32
  }
  func.func @transform_4(%arg0: i32) -> (i32, i32) {
    %c0_i32 = arith.constant 0 : i32
    %c0_i32_0 = arith.constant 0 : i32
    %c0_i32_1 = arith.constant 0 : i32
    return %c0_i32, %c0_i32_0 : i32, i32
  }
  func.func @transform_5(%arg0: i32) -> (i32, i32) {
    %c0_i32 = arith.constant 0 : i32
    %c0_i32_0 = arith.constant 0 : i32
    %c0_i32_1 = arith.constant 0 : i32
    return %c0_i32, %c0_i32_0 : i32, i32
  }
  func.func @transform_6(%arg0: i32) -> (i32, i32) {
    %c0_i32 = arith.constant 0 : i32
    %c0_i32_0 = arith.constant 0 : i32
    %c0_i32_1 = arith.constant 0 : i32
    return %c0_i32, %c0_i32_0 : i32, i32
  }
  func.func @transform_7(%arg0: i32) -> (i32, i32, i32) {
    %c0_i32 = arith.constant 0 : i32
    %c0_i32_0 = arith.constant 0 : i32
    %c0_i32_1 = arith.constant 0 : i32
    return %arg0, %c0_i32, %c0_i32_0 : i32, i32, i32
  }
}

</mosaic_0001>

<bundles_post_ra>
// kernel: tpu_custom_call.1
= control target key start
LH: loop header
LB: loop body
LE: loop exit
PB: predicated region body
PF: predicated region fallthrough
CT: control target
= control target key end

     0   :  { %12 = vsyncpa [#allocation3], 0  ;;  %s786_s0 = inlined_call_operand.hbm [shape: f32[2,8,64], index: 0, kind: input, shape index: {}]   ;;  %s787_s1 = inlined_call_operand.hbm [shape: bf16[64,256], index: 1, kind: input, shape index: {}]   ;;  %s788_s2 = inlined_call_operand.hbm [shape: f32[1,256], index: 2, kind: input, shape index: {}]   ;;  %s789_s3 = inlined_call_operand.hbm [shape: f32[9,128], index: 3, kind: input, shape index: {}]   ;;  %s790_s4 = inlined_call_operand.vmem [shape: f32[1,128], index: 4, kind: input, shape index: {}]   ;;  %s791_s5 = inlined_call_operand.hbm [shape: bf16[128,128], index: 5, kind: input, shape index: {}]   ;;  %s792_s6 = inlined_call_operand.vmem [shape: f32[1,128], index: 6, kind: input, shape index: {}]   ;;  %s793_s7 = inlined_call_operand.hbm [shape: f32[2,8,128], index: 7, kind: output, shape index: {}]  }
   0x1   :  { %13 = vsyncpa [#allocation6], 0 }
   0x2   :  { %14 = vsyncpa [#allocation9], 0 }
   0x3   :  { %15 = vsyncpa [#allocation4], 0  ;;  %s33_s26 = sshll.u32 %s787_s1, 4  ;;  %s649_s27 = smov [#allocation5]   ;;  %s34_s26 = int_to_ptr.hbm [resolvable:$true] %s33_s26 }
   0x4   :  { %s35_s28 = sshll.u32 %s649_s27, 4  ;;  %s57_s8 = sshll.u32 %s789_s3, 4  ;;  %s36_s28 = int_to_ptr.vmem [resolvable:$true] %s35_s28  ;;  %s58_s8 = int_to_ptr.hbm [resolvable:$true] %s57_s8 }
   0x5   :  { %s650_s9 = smov 128   ;;  %s651_s10 = smov 8  }
   0x6   :  { %41 = dma.hbm_to_vmem [thread:$0]  %s34_s26, 1024, %s36_s28, [#allocation6], %s650_s9, %s650_s9, %s651_s10  }
   0x7   :  { %s652_s11 = smov [#allocation8]   ;;  %s20_s1 = sshll.u32 %s786_s0, 4  ;;  %s21_s1 = int_to_ptr.hbm [resolvable:$true] %s20_s1 }
   0x8   :  { %s59_s12 = sshll.u32 %s652_s11, 4  ;;  %s47_s16 = sshll.u32 %s788_s2, 4  ;;  %s60_s12 = int_to_ptr.vmem [resolvable:$true] %s59_s12  ;;  %s48_s16 = int_to_ptr.hbm [resolvable:$true] %s47_s16 }
   0x9   :  { %65 = dma.hbm_to_vmem [thread:$0]  %s58_s8, 256, %s60_s12, [#allocation9], %s650_s9, %s650_s9, %s651_s10  }
   0xa   :  { %s653_s17 = smov [#allocation2]   ;;  %s654_s19 = smov [#allocation7]  }
   0xb   :  { %s22_s18 = sshll.u32 %s653_s17, 4  ;;  %s49_s0 = sshll.u32 %s654_s19, 4  ;;  %s23_s18 = int_to_ptr.vmem [resolvable:$true] %s22_s18  ;;  %s50_s0 = int_to_ptr.vmem [resolvable:$true] %s49_s0 }
   0xc   :  { %28 = dma.hbm_to_vmem [thread:$0]  %s21_s1, 256, %s23_s18, [#allocation3], %s650_s9, %s650_s9, %s651_s10  }
   0xd   :  { %s72_s22 = sshll.u32 %s791_s5, 4  ;;  %s655_s23 = smov [#allocation10]   ;;  %s73_s22 = int_to_ptr.hbm [resolvable:$true] %s72_s22 }
   0xe   :  { %52 = dma.hbm_to_vmem [thread:$0]  %s48_s16, 32, %s50_s0, [#allocation6]  }
   0xf   :  { %s74_s24 = sshll.u32 %s655_s23, 4  ;;  %s656_s2 = smov 64   ;;  %s75_s24 = int_to_ptr.vmem [resolvable:$true] %s74_s24 }
  0x10   :  { %s657_s25 = smov 4  }
  0x11   :  { %80 = dma.hbm_to_vmem [thread:$0]  %s73_s22, 1024, %s75_s24, [#allocation9], %s656_s2, %s656_s2, %s657_s25  }
  0x12   :  { %641 = dma.done.wait [#allocation3], 256  }
  0x13   :  { %642 = vsyncadd [#allocation3], 4294967040 }
  0x14   :  { %643 = dma.done.wait [#allocation6], 1056  }
  0x15   :  { %644 = vsyncadd [#allocation6], 4294966240 }
  0x16   :  { %645 = dma.done.wait [#allocation9], 1280  }
  0x17   :  { %646 = vsyncadd [#allocation9], 4294966016  ;;  %v426_v0 = vld [vmem:[#allocation5 + $0x30] sm:$0xf]  ;;  %v473_v1 = vld [vmem:[#allocation5 + $0x34] sm:$0xf0]  ;;  %v199_v17 = vlaneseq }
  0x18   :  { %v418_v2 = vld [vmem:[#allocation5 + $0x20] sm:$0xf]  ;;  %v427_v3 = vor.u32 %v473_v1, %v426_v0  ;;  %v471_v4 = vld [vmem:[#allocation5 + $0x24] sm:$0xf0]  ;;  %v410_v6 = vld [vmem:[#allocation5 + $0x10] sm:$0xf] }
  0x19   :  { %v419_v5 = vor.u32 %v471_v4, %v418_v2  ;;  %v469_v7 = vld [vmem:[#allocation5 + $0x14] sm:$0xf0]  ;;  %v402_v9 = vld [vmem:[#allocation5] sm:$0xf]  ;;  %v467_v10 = vld [vmem:[#allocation5 + $0x4] sm:$0xf0] }
  0x1a   :  { %169 = vmatpush.bf16.msra.mxu0 %v427_v3  ;;  %v411_v8 = vor.u32 %v469_v7, %v410_v6  ;;  %v403_v11 = vor.u32 %v467_v10, %v402_v9  ;;  %v104_v12 = vld [vmem:[#allocation2] sm:$0xff]  ;;  %v105_v13 = vld [vmem:[#allocation2 + $0x8] sm:$0xff]  ;;  %vm161_vm0 = vcmask 523264   ;;  %v729_v15 = vld [vmem:[#allocation7] sm:$0x3]  ;;  %v200_v20 = vshrl.u32 %v199_v17, 7 }
  0x1b   :  { %v725_v14 = vpack.c.bf16 %v105_v13, %v104_v12  ;;  %v117_v16 = vperm.slane %v729_v15, 0  ;;  %s658_s5 = smov 16   ;;  %s659_s26 = smov 112   ;;  %v481_v35 = vld [vmem:[#allocation10 + $0x38] sm:$0xff]  ;;  %v480_v36 = vld [vmem:[#allocation10 + $0x30] sm:$0xff]  ;;  %v479_v37 = vld [vmem:[#allocation10 + $0x28] sm:$0xff] }
  0x1c   :  { %vm203_vm1 = vcmp.ge.s32.totalorder %v200_v20, 1  ;;  %vm254_vm2 = vcmp.le.s32.totalorder %v200_v20, 6  ;;  %361 = vmatpush.bf16.msra.mxu2 %v481_v35  ;;  %v478_v38 = vld [vmem:[#allocation10 + $0x20] sm:$0xff]  ;;  %v428_v40 = vld [vmem:[#allocation5 + $0x38] sm:$0xf0]  ;;  %v477_v42 = vld [vmem:[#allocation10 + $0x18] sm:$0xff] }
  0x1d   :  { %v472_v39 = vld [vmem:[#allocation5 + $0x34] sm:$0xf]  ;;  %v470_v43 = vld [vmem:[#allocation5 + $0x24] sm:$0xf]  ;;  %v420_v44 = vld [vmem:[#allocation5 + $0x28] sm:$0xf0] }
  0x1e   :  { %170 = vmatpush.bf16.msra.mxu0 %v419_v5  ;;  %v431_v41 = vor.u32 %v472_v39, %v428_v40  ;;  %v423_v45 = vor.u32 %v470_v43, %v420_v44  ;;  %v756_v47 = vld [vmem:[#allocation8] sm:$0xff]  ;;  %v468_v51 = vld [vmem:[#allocation5 + $0x14] sm:$0xf]  ;;  %v412_v52 = vld [vmem:[#allocation5 + $0x18] sm:$0xf0]  ;;  %s660_s30 = smov [#allocation11]  }
  0x1f   :  { %v476_v48 = vld [vmem:[#allocation10 + $0x10] sm:$0xff]  ;;  %v215_v49 = vperm.slane %v756_v47, 1  ;;  %v212_v50 = vperm.slane %v756_v47, 0  ;;  %v415_v53 = vor.u32 %v468_v51, %v412_v52  ;;  %v475_v54 = vld [vmem:[#allocation10 + $0x8] sm:$0xff]  ;;  %v404_v56 = vld [vmem:[#allocation5 + $0x8] sm:$0xf0] }
  0x20   :  { %362 = vmatpush.bf16.msra.mxu2 %v480_v36  ;;  %183 = vmatpush.bf16.msra.mxu1 %v431_v41  ;;  %v466_v55 = vld [vmem:[#allocation5 + $0x4] sm:$0xf]  ;;  %v224_v57 = vperm.slane %v756_v47, 2  ;;  %v233_v62 = vperm.slane %v756_v47, 3  ;;  %v474_v0 = vld [vmem:[#allocation10] sm:$0xff]  ;;  %v238_v3 = vperm.slane %v756_v47, 4 }
  0x21   :  { %v407_v60 = vor.u32 %v466_v55, %v404_v56  ;;  %v247_v20 = vperm.slane %v756_v47, 5  ;;  %v495_v43 = vld [vmem:[%s790_s4] ss:$0 sm:$0xff]  ;;  %s383_s8 = sshll.u32 %s660_s30, 4  ;;  %s385_s13 = sshll.u32 %s793_s7, 4  ;;  %s384_s8 = int_to_ptr.vmem [resolvable:$true] %s383_s8  ;;  %s386_s13 = int_to_ptr.hbm [resolvable:$true] %s385_s13 }
  0x22   :  { %171 = vmatpush.bf16.msra.mxu0 %v411_v8 }
  0x24   :  { %363 = vmatpush.bf16.msra.mxu2 %v479_v37  ;;  %184 = vmatpush.bf16.msra.mxu1 %v423_v45  ;;  %v494_v37 = vld [vmem:[#allocation8 + $0x8] ss:$0 sm:$0xff] }
  0x26   :  { %172 = vmatpush.bf16.msra.mxu0 %v403_v11 }
  0x28   :  { %364 = vmatpush.bf16.msra.mxu2 %v478_v38  ;;  %185 = vmatpush.bf16.msra.mxu1 %v415_v53 }
  0x29   :  { %432 = vmatmul.msk.bf16.vlgmr.msra.gmra.mxu0 %vm161_vm0, %v725_v14 }
  0x2c   :  { %365 = vmatpush.bf16.msra.mxu2 %v477_v42  ;;  %186 = vmatpush.bf16.msra.mxu1 %v407_v60 }
  0x2f   :  { %433 = vmatmul.msk.bf16.vlgmr.msra.gmra.mxu1 %vm161_vm0, %v725_v14 }
  0x30   :  { %366 = vmatpush.bf16.msra.mxu2 %v476_v48 }
  0x34   :  { %367 = vmatpush.bf16.msra.mxu2 %v475_v54 }
  0x38   :  { %368 = vmatpush.bf16.msra.mxu2 %v474_v0 }
  0xa6   :  { %v174_v18 = vpop.f32.mrf.mxu0 }
  0xa7   :  { %v175_v19 = vadd.f32 %v174_v18, %v117_v16 }
  0xa9   :  { %v193_v21 = vmax.f32 %v175_v19, 0.0 }
  0xab   :  { %v732_v22 = vmin.f32 %v193_v21, 6.0  ;;  %v263_v21 = vperm.slane %v756_v47, 6 }
  0xad   :  { %229 = vrot.lane.b32.xlu2 %v732_v22, %s658_s5  ;;  %v201_v23 = vrot.slane %v732_v22, 7  ;;  %v252_v31 = vrot.slane %v732_v22, 1  ;;  %v239_v7 = vmul.f32 %v238_v3, %v732_v22 }
  0xae   :  { %v176_v24 = vpop.f32.mrf.mxu0 }
  0xaf   :  { %v177_v25 = vadd.f32 %v176_v24, %v117_v16  ;;  %v206_v26 = vsel %vm203_vm1, %v201_v23, 0.0  ;;  %v745_v32 = vsel %vm254_vm2, %v252_v31, 0.0 }
  0xb0   :  { %220 = vrot.lane.b32.xlu1 %v206_v26, %s659_s26  ;;  %208 = vrot.lane.b32.xlu0 %v206_v26, %s658_s5  ;;  %v216_v61 = vmul.f32 %v215_v49, %v206_v26  ;;  %v268_v26 = vperm.slane %v756_v47, 7 }
  0xb1   :  { %v194_v27 = vmax.f32 %v177_v25, 0.0 }
  0xb3   :  { %v736_v28 = vmin.f32 %v194_v27, 6.0 }
  0xb5   :  { %231 = vrot.lane.b32.xlu2 %v736_v28, %s658_s5  ;;  %v202_v29 = vrot.slane %v736_v28, 7  ;;  %v253_v33 = vrot.slane %v736_v28, 1 }
  0xb7   :  { %v740_v30 = vsel %vm203_vm1, %v202_v29, 0.0  ;;  %v751_v34 = vsel %vm254_vm2, %v253_v33, 0.0  ;;  %v269_v33 = vmul.f32 %v268_v26, %v745_v32 }
  0xb8   :  { %222 = vrot.lane.b32.xlu1 %v740_v30, %s659_s26  ;;  %210 = vrot.lane.b32.xlu0 %v740_v30, %s658_s5  ;;  %v217_v11 = vmul.f32 %v215_v49, %v740_v30  ;;  %v270_v45 = vmul.f32 %v268_v26, %v751_v34 }
  0xbd   :  { %259 = vrot.lane.b32.xlu2 %v745_v32, %s658_s5 }
  0xc0   :  { %245 = vrot.lane.b32.xlu1 %v736_v28, %s659_s26  ;;  %243 = vrot.lane.b32.xlu0 %v732_v22, %s659_s26  ;;  %v240_v22 = vmul.f32 %v238_v3, %v736_v28 }
  0xc5   :  { %275 = vrot.lane.b32.xlu2 %v751_v34, %s659_s26 }
  0xc8   :  { %273 = vrot.lane.b32.xlu1 %v745_v32, %s659_s26  ;;  %261 = vrot.lane.b32.xlu0 %v751_v34, %s658_s5  ;;  %v496_v34 = vld [vmem:[%s792_s6] ss:$0 sm:$0xff] }
 0x107   :  { %v230_v46 = vpop.permute.xlu2 %229 }
 0x108   :  { %v234_v4 = vmul.f32 %v233_v62, %v230_v46 }
 0x10f   :  { %v232_v5 = vpop.permute.xlu2 %231 }
 0x110   :  { %v235_v18 = vmul.f32 %v233_v62, %v232_v5 }
 0x117   :  { %v260_v23 = vpop.permute.xlu2 %259 }
 0x118   :  { %v264_v30 = vmul.f32 %v263_v21, %v260_v23 }
 0x11f   :  { %v276_v44 = vpop.permute.xlu2 %275 }
 0x120   :  { %v279_v48 = vmul.f32 %v494_v37, %v276_v44 }
 0x122   :  { %v221_v58 = vpop.permute.xlu1 %220  ;;  %v209_v59 = vpop.permute.xlu0 %208 }
 0x123   :  { %v213_v63 = vmul.f32 %v212_v50, %v209_v59  ;;  %v225_v1 = vmul.f32 %v224_v57, %v221_v58  ;;  %v188_v58 = vpop.f32.mrf.mxu1 }
 0x125   :  { %v218_v2 = vadd.f32 %v216_v61, %v213_v63 }
 0x127   :  { %v227_v6 = vadd.f32 %v225_v1, %v218_v2 }
 0x129   :  { %v236_v8 = vadd.f32 %v234_v4, %v227_v6 }
 0x12a   :  { %v223_v9 = vpop.permute.xlu1 %222  ;;  %v211_v10 = vpop.permute.xlu0 %210 }
 0x12b   :  { %v214_v12 = vmul.f32 %v212_v50, %v211_v10  ;;  %v241_v13 = vadd.f32 %v239_v7, %v236_v8  ;;  %v226_v16 = vmul.f32 %v224_v57, %v223_v9  ;;  %v118_v57 = vperm.slane %v729_v15, 1  ;;  %v190_v63 = vpop.f32.mrf.mxu1 }
 0x12d   :  { %v219_v17 = vadd.f32 %v217_v11, %v214_v12  ;;  %v189_v59 = vadd.f32 %v188_v58, %v118_v57  ;;  %v191_v1 = vadd.f32 %v190_v63, %v118_v57 }
 0x12f   :  { %v228_v19 = vadd.f32 %v226_v16, %v219_v17 }
 0x131   :  { %v237_v24 = vadd.f32 %v235_v18, %v228_v19 }
 0x132   :  { %v246_v25 = vpop.permute.xlu1 %245  ;;  %v244_v14 = vpop.permute.xlu0 %243 }
 0x133   :  { %v242_v27 = vadd.f32 %v240_v22, %v237_v24  ;;  %v248_v29 = vmul.f32 %v247_v20, %v244_v14  ;;  %v249_v35 = vmul.f32 %v247_v20, %v246_v25 }
 0x135   :  { %v250_v31 = vadd.f32 %v248_v29, %v241_v13  ;;  %v251_v41 = vadd.f32 %v249_v35, %v242_v27 }
 0x137   :  { %v266_v36 = vadd.f32 %v264_v30, %v250_v31 }
 0x139   :  { %v271_v38 = vadd.f32 %v269_v33, %v266_v36 }
 0x13a   :  { %v274_v39 = vpop.permute.xlu1 %273  ;;  %v262_v40 = vpop.permute.xlu0 %261 }
 0x13b   :  { %v278_v42 = vmul.f32 %v494_v37, %v274_v39  ;;  %v265_v28 = vmul.f32 %v263_v21, %v262_v40 }
 0x13d   :  { %v280_v46 = vadd.f32 %v278_v42, %v271_v38  ;;  %v267_v47 = vadd.f32 %v265_v28, %v251_v41 }
 0x13f   :  { %v272_v32 = vadd.f32 %v270_v45, %v267_v47  ;;  %v286_v49 = vadd.f32 %v495_v43, %v280_v46 }
 0x141   :  { %v281_v50 = vadd.f32 %v279_v48, %v272_v32  ;;  %v288_v52 = vmax.f32 %v286_v49, 0.0 }
 0x143   :  { %v287_v51 = vadd.f32 %v495_v43, %v281_v50  ;;  %v290_v54 = vmin.f32 %v288_v52, 6.0 }
 0x145   :  { %v289_v53 = vmax.f32 %v287_v51, 0.0 }
 0x147   :  { %v291_v55 = vmin.f32 %v289_v53, 6.0 }
 0x149   :  { %v292_v56 = vpack.c.bf16 %v291_v55, %v290_v54 }
 0x14b   :  { %369 = vmatmul.bf16.vlgmr.msra.gmra.mxu2 %v292_v56 }
 0x1ce   :  { %v370_v60 = vpop.f32.mrf.mxu2 }
 0x1cf   :  { %v371_v61 = vadd.f32 %v496_v34, %v370_v60 }
 0x1d1   :  { %v375_v62 = vadd.f32 %v371_v61, %v189_v59 }
 0x1d3   :  { %377 = vst [vmem:[#allocation11] sm:$0xff] %v375_v62 }
 0x1d6   :  { %v372_v0 = vpop.f32.mrf.mxu2 }
 0x1d7   :  { %v373_v15 = vadd.f32 %v496_v34, %v372_v0 }
 0x1d9   :  { %v376_v2 = vadd.f32 %v373_v15, %v191_v1 }
 0x1db   :  { %378 = vst [vmem:[#allocation11 + $0x8] sm:$0xff] %v376_v2 }
 0x1dc   :  { %391 = dma.vmem_to_hbm [thread:$0]  %s384_s8, 256, %s386_s13, [#allocation4], %s650_s9, %s650_s9, %s651_s10  }
 0x1dd   :  { %647 = dma.done.wait [#allocation4], 256  }
 0x1de   :  { %648 = vsyncadd [#allocation4], 4294967040 }
 0x1df   :  { %396 = vsyncpa [#allocation3], 1 }
 0x1e0   :  { %397 = vsyncpa [#allocation6], 1 }
 0x1e1   :  { %398 = vsyncpa [#allocation9], 1 }
 0x1e2   :  { %399 = vsyncpa [#allocation4], 1 }

</bundles_post_ra>
